<compile_context>
chip_gen: v7x
topology: tpu7x:2x2x1
jax: 0.10.0
libtpu: 0.0.40
codegen_flags: <defaults>
</compile_context>

<pallas_src>
from functools import partial

import jax
import jax.numpy as jnp
from jax.experimental import pallas as pl
from jax.experimental.pallas import tpu as pltpu


# --------------------------------------------------------------------------
# Kernels
# --------------------------------------------------------------------------
def _ca_fused_kernel(x_ref, w1_ref, b1_ref, w2_ref, b2_ref, o_ref, *, inv_hw):
    """Fused path: one (1, C, HW) sample resident -> pool + MLP + rescale."""
    x = x_ref[0]                                                 # (C, HW)
    # Global average pool (exact: sum over the true HW, times 1/HW).
    pooled = jnp.sum(x.astype(jnp.float32), axis=-1, keepdims=True) * inv_hw
    # conv_du[0] (1x1 conv C -> Cr) + ReLU.
    h = jnp.maximum(
        jnp.dot(w1_ref[...], pooled, preferred_element_type=jnp.float32)
        + b1_ref[...], 0.0)                                      # (Cr, 1)
    # conv_du[2] (1x1 conv Cr -> C) + Sigmoid.
    scale = jax.nn.sigmoid(
        jnp.dot(w2_ref[...], h, preferred_element_type=jnp.float32)
        + b2_ref[...])                                           # (C, 1)
    # Channel-wise rescale: (C, 1) lane-broadcasts over the HW axis.
    o_ref[0] = (x * scale).astype(o_ref.dtype)


def _ca_pool_mlp_kernel(x_ref, w1_ref, b1_ref, w2_ref, b2_ref, s_ref, acc_ref,
                        *, inv_hw, hw, hw_tile, ragged):
    """Tiled path, kernel 1: reduce over HW tiles, emit the (1, C, 1) scale."""
    t = pl.program_id(1)

    @pl.when(t == 0)
    def _init():
        acc_ref[...] = jnp.zeros_like(acc_ref)

    x = x_ref[0].astype(jnp.float32)                             # (C, hw_tile)
    if ragged:
        # Mask lanes of the (partial) last tile that fall past the true HW.
        lane = jax.lax.broadcasted_iota(jnp.int32, x.shape, 1) + t * hw_tile
        x = jnp.where(lane < hw, x, 0.0)
    acc_ref[...] += jnp.sum(x, axis=-1, keepdims=True)           # (C, 1)

    @pl.when(t == pl.num_programs(1) - 1)
    def _finalize():
        pooled = acc_ref[...] * inv_hw                           # (C, 1)
        h = jnp.maximum(
            jnp.dot(w1_ref[...], pooled, preferred_element_type=jnp.float32)
            + b1_ref[...], 0.0)                                  # (Cr, 1)
        scale = jax.nn.sigmoid(
            jnp.dot(w2_ref[...], h, preferred_element_type=jnp.float32)
            + b2_ref[...])                                       # (C, 1)
        s_ref[0] = scale.astype(s_ref.dtype)


def _ca_scale_kernel(x_ref, s_ref, o_ref):
    """Tiled path, kernel 2: lane-dense broadcast multiply."""
    # (1, C, hw_tile) * (1, C, 1): native broadcast from the size-1 lane dim.
    # OOB lanes of a ragged last tile are computed on garbage but their
    # writeback is dropped by Pallas, so no masking is needed here.
    o_ref[...] = (x_ref[...] * s_ref[...]).astype(o_ref.dtype)


# --------------------------------------------------------------------------
# Wrapper
# --------------------------------------------------------------------------
def _round_up(v, m):
    return (v + m - 1) // m * m


def _vmem_capacity_bytes():
    """Physical VMEM per core; falls back to 128 MiB (v5e/v6e) if unknown."""
    try:
        cap = getattr(pltpu.get_tpu_info(), "vmem_capacity_bytes", None)
        if cap:
            return int(cap)
    except Exception:
        pass
    return 128 * 1024 * 1024


def ca_layer(x_nchw, w1, b1, w2, b2, *,
             block_budget_bytes=None,
             vmem_limit_bytes=None,
             force_tiled=False, hw_tile=None):
    """Channel attention: x * sigmoid(W2 @ relu(W1 @ avgpool(x) + b1) + b2).

    x_nchw: (N, C, H, W); w1: (C//r, C); b1: (C//r, 1); w2: (C, C//r);
    b2: (C, 1).  Returns (N, C, H, W)."""
    N, C, H, W = x_nchw.shape
    HW = H * W
    Cr = w1.shape[0]
    dtype = x_nchw.dtype
    isz = jnp.dtype(dtype).itemsize
    inv_hw = 1.0 / float(HW)

    # Generation-aware VMEM sizing (v7x: 64 MiB -> ~48/38 MiB; v5e/v6e:
    # 128 MiB -> ~96/76 MiB).
    cap = _vmem_capacity_bytes()
    if vmem_limit_bytes is None:
        vmem_limit_bytes = (cap * 3) // 4
    if block_budget_bytes is None:
        block_budget_bytes = (cap * 3) // 5

    def cparams(sem):
        return pltpu.CompilerParams(dimension_semantics=sem,
                                    vmem_limit_bytes=int(vmem_limit_bytes))

    # Trivial reshape (contiguous minor dims) -- no HBM pass.
    x3 = x_nchw.reshape(N, C, HW)

    # Double-buffered input block + double-buffered output block.
    fused_bytes = 4 * C * HW * isz

    if not force_tiled and fused_bytes <= block_budget_bytes:
        # ---------------- Fused 2-pass path (one HBM read + one write) ------
        # grid=(N,), bn=1: restores DMA/compute pipelining across samples and
        # keeps both v7x TensorCores busy whenever N >= 2.
        out = pl.pallas_call(
            partial(_ca_fused_kernel, inv_hw=inv_hw),
            out_shape=jax.ShapeDtypeStruct((N, C, HW), dtype),
            grid_spec=pltpu.PrefetchScalarGridSpec(
                num_scalar_prefetch=0,
                grid=(N,),
                in_specs=[
                    pl.BlockSpec((1, C, HW), lambda i: (i, 0, 0)),
                    pl.BlockSpec((Cr, C), lambda i: (0, 0)),
                    pl.BlockSpec((Cr, 1), lambda i: (0, 0)),
                    pl.BlockSpec((C, Cr), lambda i: (0, 0)),
                    pl.BlockSpec((C, 1), lambda i: (0, 0)),
                ],
                out_specs=pl.BlockSpec((1, C, HW), lambda i: (i, 0, 0)),
            ),
            compiler_params=cparams(("parallel",)),
        )(x3, w1, b1, w2, b2)
    else:
        # ---------------- Tiled 3-pass path (very large H*W) ----------------
        if hw_tile is None:
            # hw_tile >= 512 lanes preferred (HBM pipelining efficiency);
            # bn is already 1 so there is nothing else to shrink first.
            hw_tile = (block_budget_bytes // (4 * C * isz)) // 128 * 128
            hw_tile = int(max(512, hw_tile))
        hw_tile = int(max(128, min(hw_tile, _round_up(HW, 128))))
        assert hw_tile % 128 == 0, "hw_tile must be a multiple of 128 lanes"
        nt = pl.cdiv(HW, hw_tile)
        ragged = (HW % hw_tile) != 0

        # Kernel 1: global average pool (HW-tile reduction) + SE-MLP.
        scale = pl.pallas_call(
            partial(_ca_pool_mlp_kernel, inv_hw=inv_hw, hw=HW,
                    hw_tile=hw_tile, ragged=ragged),
            out_shape=jax.ShapeDtypeStruct((N, C, 1), jnp.float32),
            grid_spec=pltpu.PrefetchScalarGridSpec(
                num_scalar_prefetch=0,
                grid=(N, nt),
                in_specs=[
                    pl.BlockSpec((1, C, hw_tile), lambda i, t: (i, 0, t)),
                    pl.BlockSpec((Cr, C), lambda i, t: (0, 0)),
                    pl.BlockSpec((Cr, 1), lambda i, t: (0, 0)),
                    pl.BlockSpec((C, Cr), lambda i, t: (0, 0)),
                    pl.BlockSpec((C, 1), lambda i, t: (0, 0)),
                ],
                out_specs=pl.BlockSpec((1, C, 1), lambda i, t: (i, 0, 0)),
                scratch_shapes=[pltpu.VMEM((C, 1), jnp.float32)],
            ),
            compiler_params=cparams(("parallel", "arbitrary")),
        )(x3, w1, b1, w2, b2)

        # Kernel 2: broadcast multiply, fully parallel over (batch, HW tiles).
        out = pl.pallas_call(
            _ca_scale_kernel,
            out_shape=jax.ShapeDtypeStruct((N, C, HW), dtype),
            grid_spec=pltpu.PrefetchScalarGridSpec(
                num_scalar_prefetch=0,
                grid=(N, nt),
                in_specs=[
                    pl.BlockSpec((1, C, hw_tile), lambda i, t: (i, 0, t)),
                    pl.BlockSpec((1, C, 1), lambda i, t: (i, 0, 0)),
                ],
                out_specs=pl.BlockSpec((1, C, hw_tile),
                                       lambda i, t: (i, 0, t)),
            ),
            compiler_params=cparams(("parallel", "parallel")),
        )(x3, scale)

    return out.reshape(N, C, H, W)


# --------------------------------------------------------------------------
# Pure-JAX reference (mirrors the PyTorch forward)
# --------------------------------------------------------------------------
def _reference(x, w1, b1, w2, b2):
    pooled = jnp.mean(x, axis=(2, 3))                       # (N, C)
    h = jnp.maximum(pooled @ w1.T + b1[:, 0], 0.0)          # (N, Cr)
    y = jax.nn.sigmoid(h @ w2.T + b2[:, 0])                 # (N, C)
    return x * y[:, :, None, None]


if __name__ == "__main__":
    key = jax.random.PRNGKey(0)
    k_a, k_b, k_c = jax.random.split(key, 3)

    def make_inputs(k, N, C, H, W, reduction=16):
        Cr = max(C // reduction, 1)
        kx, k1, k2, k3, k4 = jax.random.split(k, 5)
        x = jax.random.normal(kx, (N, C, H, W), dtype=jnp.float32)
        w1 = jax.random.normal(k1, (Cr, C), dtype=jnp.float32) * 0.1
        b1 = jax.random.normal(k2, (Cr, 1), dtype=jnp.float32) * 0.1
        w2 = jax.random.normal(k3, (C, Cr), dtype=jnp.float32) * 0.1
        b2 = jax.random.normal(k4, (C, 1), dtype=jnp.float32) * 0.1
        return x, w1, b1, w2, b2

    # 1) Fused path, lane-aligned spatial (H*W = 256), grid=(N,).
    x, w1, b1, w2, b2 = make_inputs(k_a, N=2, C=64, H=16, W=16)
    ref = _reference(x, w1, b1, w2, b2)
    out = jax.block_until_ready(ca_layer(x, w1, b1, w2, b2))
    assert out.shape == x.shape
    assert jnp.allclose(out, ref, atol=1e-5, rtol=1e-5), "fused path mismatch"

    # 2) Fused path, non-128-aligned spatial (H*W = 100): handled without any
    #    host-side pad/slice (full-extent last block dim).
    x2, w12, b12, w22, b22 = make_inputs(k_b, N=2, C=32, H=10, W=10)
    ref2 = _reference(x2, w12, b12, w22, b22)
    out2 = jax.block_until_ready(ca_layer(x2, w12, b12, w22, b22))
    assert jnp.allclose(out2, ref2, atol=1e-5, rtol=1e-5), "fused ragged mismatch"

    # 3) Tiled path (what very large feature maps take), forced here with
    #    128-lane HW tiles; H*W = 256 divides evenly.
    out_t = jax.block_until_ready(
        ca_layer(x, w1, b1, w2, b2, force_tiled=True, hw_tile=128))
    assert jnp.allclose(out_t, ref, atol=1e-5, rtol=1e-5), "tiled path mismatch"

    # 4) Tiled path with a ragged last tile (H*W = 324, tiles of 128): padded
    #    lanes are masked out of the pool in-kernel, OOB output writes dropped.
    x4, w14, b14, w24, b24 = make_inputs(k_c, N=2, C=32, H=18, W=18)
    ref4 = _reference(x4, w14, b14, w24, b24)
    out4 = jax.block_until_ready(
        ca_layer(x4, w14, b14, w24, b24, force_tiled=True, hw_tile=128))
    assert jnp.allclose(out4, ref4, atol=1e-5, rtol=1e-5), "tiled ragged mismatch"

    print("KERNEL_OK")
</pallas_src>

<mosaic_0001>
module attributes {stable_mosaic.version = 11 : i64} {
  func.func @_ca_fused_kernel(%arg0: i32, %arg1: memref<1x64x256xf32, #tpu.memory_space<vmem>>, %arg2: memref<4x64xf32, #tpu.memory_space<vmem>>, %arg3: memref<4x1xf32, #tpu.memory_space<vmem>>, %arg4: memref<64x4xf32, #tpu.memory_space<vmem>>, %arg5: memref<64x1xf32, #tpu.memory_space<vmem>>, %arg6: memref<1x64x256xf32, #tpu.memory_space<vmem>>) attributes {dimension_semantics = [#tpu.dimension_semantics<parallel>], iteration_bounds = array<i64: 2>, scalar_prefetch = 0 : i64, scratch_operands = 0 : i64, tpu.core_type = #tpu.core_type<tc>, window_params = [{transform_indices = @transform_0, window_bounds = array<i64: 1, 64, 256>}, {pipeline_mode = #tpu.pipeline_mode<synchronous>, transform_indices = @transform_1, window_bounds = array<i64: 4, 64>}, {pipeline_mode = #tpu.pipeline_mode<synchronous>, transform_indices = @transform_2, window_bounds = array<i64: 4, 1>}, {pipeline_mode = #tpu.pipeline_mode<synchronous>, transform_indices = @transform_3, window_bounds = array<i64: 64, 4>}, {pipeline_mode = #tpu.pipeline_mode<synchronous>, transform_indices = @transform_4, window_bounds = array<i64: 64, 1>}, {transform_indices = @transform_5, window_bounds = array<i64: 1, 64, 256>}]} {
    %c0 = arith.constant 0 : index
    %c0_0 = arith.constant 0 : index
    %c0_1 = arith.constant 0 : index
    %0 = vector.load %arg1[%c0, %c0_0, %c0_1] : memref<1x64x256xf32, #tpu.memory_space<vmem>>, vector<1x64x256xf32>
    %1 = vector.shape_cast %0 : vector<1x64x256xf32> to vector<64x256xf32>
    %cst = arith.constant dense<0.000000e+00> : vector<64xf32>
    %2 = vector.multi_reduction <add>, %1, %cst [1] : vector<64x256xf32> to vector<64xf32>
    %3 = vector.shape_cast %2 : vector<64xf32> to vector<64x1xf32>
    %cst_2 = arith.constant 3.906250e-03 : f32
    %4 = vector.broadcast %cst_2 : f32 to vector<64x1xf32>
    %5 = arith.mulf %3, %4 : vector<64x1xf32>
    %c0_3 = arith.constant 0 : index
    %c0_4 = arith.constant 0 : index
    %6 = vector.load %arg2[%c0_3, %c0_4] : memref<4x64xf32, #tpu.memory_space<vmem>>, vector<4x64xf32>
    %cst_5 = arith.constant dense<0.000000e+00> : vector<4x1xf32>
    %7 = tpu.matmul %6, %5, %cst_5 {dimension_numbers = #tpu.dot_dimension_numbers<[1], [0], [0], [1], [0, 0, 1, 1], [], []>} : vector<4x64xf32>, vector<64x1xf32>, vector<4x1xf32> -> vector<4x1xf32>
    %c0_6 = arith.constant 0 : index
    %c0_7 = arith.constant 0 : index
    %8 = vector.load %arg3[%c0_6, %c0_7] : memref<4x1xf32, #tpu.memory_space<vmem>>, vector<4x1xf32>
    %9 = arith.addf %7, %8 : vector<4x1xf32>
    %cst_8 = arith.constant 0.000000e+00 : f32
    %10 = vector.broadcast %cst_8 : f32 to vector<4x1xf32>
    %11 = arith.maximumf %9, %10 : vector<4x1xf32>
    %c0_9 = arith.constant 0 : index
    %c0_10 = arith.constant 0 : index
    %12 = vector.load %arg4[%c0_9, %c0_10] : memref<64x4xf32, #tpu.memory_space<vmem>>, vector<64x4xf32>
    %cst_11 = arith.constant dense<0.000000e+00> : vector<64x1xf32>
    %13 = tpu.matmul %12, %11, %cst_11 {dimension_numbers = #tpu.dot_dimension_numbers<[1], [0], [0], [1], [0, 0, 1, 1], [], []>} : vector<64x4xf32>, vector<4x1xf32>, vector<64x1xf32> -> vector<64x1xf32>
    %c0_12 = arith.constant 0 : index
    %c0_13 = arith.constant 0 : index
    %14 = vector.load %arg5[%c0_12, %c0_13] : memref<64x1xf32, #tpu.memory_space<vmem>>, vector<64x1xf32>
    %15 = arith.addf %13, %14 : vector<64x1xf32>
    %16 = arith.negf %15 : vector<64x1xf32>
    %17 = math.exp %16 : vector<64x1xf32>
    %cst_14 = arith.constant 1.000000e+00 : f32
    %18 = vector.broadcast %cst_14 : f32 to vector<64x1xf32>
    %19 = arith.addf %18, %17 : vector<64x1xf32>
    %20 = arith.divf %18, %19 : vector<64x1xf32>
    %21 = vector.broadcast %20 : vector<64x1xf32> to vector<64x256xf32>
    %22 = arith.mulf %1, %21 : vector<64x256xf32>
    %c0_15 = arith.constant 0 : index
    %c0_16 = arith.constant 0 : index
    %c0_17 = arith.constant 0 : index
    %23 = vector.load %arg6[%c0_15, %c0_16, %c0_17] : memref<1x64x256xf32, #tpu.memory_space<vmem>>, vector<1x64x256xf32>
    %24 = vector.shape_cast %23 : vector<1x64x256xf32> to vector<64x256xf32>
    %25 = vector.shape_cast %22 : vector<64x256xf32> to vector<1x64x256xf32>
    tpu.vector_store %arg6[%c0_15, %c0_16, %c0_17], %25 {strides = array<i32>} : memref<1x64x256xf32, #tpu.memory_space<vmem>>, vector<1x64x256xf32>,
    return
  }
  func.func @transform_0(%arg0: i32) -> (i32, i32, i32) {
    %c0_i32 = arith.constant 0 : i32
    %c0_i32_0 = arith.constant 0 : i32
    %c0_i32_1 = arith.constant 0 : i32
    return %arg0, %c0_i32, %c0_i32_0 : i32, i32, i32
  }
  func.func @transform_1(%arg0: i32) -> (i32, i32) {
    %c0_i32 = arith.constant 0 : i32
    %c0_i32_0 = arith.constant 0 : i32
    %c0_i32_1 = arith.constant 0 : i32
    return %c0_i32, %c0_i32_0 : i32, i32
  }
  func.func @transform_2(%arg0: i32) -> (i32, i32) {
    %c0_i32 = arith.constant 0 : i32
    %c0_i32_0 = arith.constant 0 : i32
    %c0_i32_1 = arith.constant 0 : i32
    return %c0_i32, %c0_i32_0 : i32, i32
  }
  func.func @transform_3(%arg0: i32) -> (i32, i32) {
    %c0_i32 = arith.constant 0 : i32
    %c0_i32_0 = arith.constant 0 : i32
    %c0_i32_1 = arith.constant 0 : i32
    return %c0_i32, %c0_i32_0 : i32, i32
  }
  func.func @transform_4(%arg0: i32) -> (i32, i32) {
    %c0_i32 = arith.constant 0 : i32
    %c0_i32_0 = arith.constant 0 : i32
    %c0_i32_1 = arith.constant 0 : i32
    return %c0_i32, %c0_i32_0 : i32, i32
  }
  func.func @transform_5(%arg0: i32) -> (i32, i32, i32) {
    %c0_i32 = arith.constant 0 : i32
    %c0_i32_0 = arith.constant 0 : i32
    %c0_i32_1 = arith.constant 0 : i32
    return %arg0, %c0_i32, %c0_i32_0 : i32, i32, i32
  }
}

</mosaic_0001>

<bundles_post_ra>
// kernel: tpu_custom_call.1
= control target key start
LH: loop header
LB: loop body
LE: loop exit
PB: predicated region body
PF: predicated region fallthrough
CT: control target
= control target key end

     0   :  { %10 = vsyncpa [#allocation3], 0  ;;  %s1706_s0 = inlined_call_operand.hbm [shape: f32[2,64,256], index: 0, kind: input, shape index: {}]   ;;  %s1707_s1 = inlined_call_operand.hbm [shape: f32[4,64], index: 1, kind: input, shape index: {}]   ;;  %s1708_s2 = inlined_call_operand.hbm [shape: f32[4,1], index: 2, kind: input, shape index: {}]   ;;  %s1709_s3 = inlined_call_operand.hbm [shape: f32[64,4], index: 3, kind: input, shape index: {}]   ;;  %s1710_s4 = inlined_call_operand.hbm [shape: f32[64,1], index: 4, kind: input, shape index: {}]   ;;  %s1711_s5 = inlined_call_operand.hbm [shape: f32[2,64,256], index: 5, kind: output, shape index: {}]  }
   0x1   :  { %12 = vsyncpa [#allocation3 + $0x1], 0 }
   0x2   :  { %13 = vsyncpa [#allocation6], 0 }
   0x3   :  { %14 = vsyncpa [#allocation9], 0 }
   0x4   :  { %15 = vsyncpa [#allocation4], 0 }
   0x5   :  { %17 = vsyncpa [#allocation4 + $0x1], 0  ;;  %s1317_s18 = smov 0   ;;  %s1319_s19 = smov 0  }
   0x6   :  { %s1321_s20 = smov 0   ;;  %s1323_s21 = smov 0  }
   0x7 LB: > { %s1338_s22 = sadd.s32 4294967295, %s1269_s21   ;;  %s817_s23 = sadd.s32 4294967294, %s1269_s21   ;;  %s1269_s21 = sphi %s1323_s21, %s1734_s21   ;;  %s1265_s20 = sphi %s1321_s20, %s1733_s20   ;;  %s1261_s19 = sphi %s1319_s19, %s1732_s19   ;;  %s1257_s18 = sphi %s1317_s18, %s1731_s18  }
   0x8   : > { %p43_p0 = scmp.ne.s32.totalorder %s1261_s19, %s1257_s18  ;;  %p1712_p1 = scmp.eq.s32.totalorder %s1338_s22, 0 }
   0x9   : > { %p157_p3 = scmp.eq.s32.totalorder %s817_s23, 1  ;;  %p818_p5 = scmp.ge.s32.totalorder %s1269_s21, 1 }
   0xa   : > { %p1347_p4 = por %p1712_p1, %p43_p0  ;;  %p164_p7 = scmp.lt.s32.totalorder %s1269_s21, 3 }
   0xb   : > { %p1352_p6 = por %p157_p3, %p43_p0  ;;  %s1271_s27 = smov [#allocation5]  }
   0xc   : > { %s1715_s24 = scalar_select %p1347_p4, 1, 0 }
   0xd   : > { %s1716_s25 = scalar_select %p1352_p6, 1, 0 }
   0xe   : > { %p1357_p8 = pnand %p818_p5, %p164_p7  ;;  %s177_s28 = sshll.u32 %s1271_s27, 4  ;;  %s178_s28 = int_to_ptr.vmem [resolvable:$true] %s177_s28 }
   0xf   : > { %s1272_s29 = smov [#allocation8]   ;;  %s1273_s7 = smov [#allocation7]  }
  0x10   : > { %s1717_s26 = scalar_select %p1357_p8, 1, 0 }
  0x11   : > { %p942_p10 = pneg %p1357_p8  ;;  %s198_s30 = sshll.u32 %s1272_s29, 4  ;;  %s1370_s30 = int_to_ptr.vmem [resolvable:$true] %s198_s30 }
  0x12   : > { %s1372_s8 = sshll.u32 %s1273_s7, 4  ;;  %s1053_s11 = scalar_lea.hbm %s1707_s1, 64  ;;  %s189_s8 = int_to_ptr.vmem [resolvable:$true] %s1372_s8 }
  0x13   : > { %p1366_p11 = pnand %p942_p10, %p1712_p1  ;;  %p1054_p12 = scmp.ne.s32.totalorder %s1707_s1, %s1053_s11 }
  0x14   : > { %p1060_p5 = scmp.lt.u32.totalorder %s1053_s11, %s1707_s1 }
  0x15   : > { %p1382_p13 = pneg %p1366_p11 }
  0x17   : > { %p1056_p0 = pnand %p1382_p13, %p1054_p12 }
  0x19   : > { %p1057_p3 = pneg %p1056_p0 }
  0x1b   : > { %p1062_p7 = pnand %p1060_p5, %p1057_p3 }
  0x1d   : > { %1065 = shalt.err (!%p1062_p7)
}
  0x1e   : > { %s1066_s17 = scalar_lea.vmem %s178_s28, 64  ;;  %p1074_p2 = scmp.lt.s32.totalorder %s178_s28, %s178_s28 }
  0x1f   : > { %p1067_p10 = scmp.ne.s32.totalorder %s178_s28, %s1066_s17  ;;  %p1075_p6 = scmp.lt.s32.totalorder %s1066_s17, %s1066_s17 }
  0x21   : > { %p1069_p9 = pnand %p1067_p10, %p1382_p13  ;;  %p1076_p4 = por %p1075_p6, %p1074_p2 }
  0x23   : > { %p1070_p1 = pneg %p1069_p9 }
  0x25   : > { %p1077_p8 = pnand %p1076_p4, %p1070_p1 }
  0x27   : > { %1080 = shalt.err (!%p1077_p8)
}
  0x28   : > { %945 = dma.hbm_to_vmem [thread:$0]  (!%p1366_p11), %s1707_s1, 64, %s178_s28, [#allocation6]  }
  0x29   : > { %s1081_s9 = scalar_lea.hbm %s1709_s3, 1024 }
  0x2a   : > { %p1082_p9 = scmp.ne.s32.totalorder %s1709_s3, %s1081_s9  ;;  %p1088_p1 = scmp.lt.u32.totalorder %s1081_s9, %s1709_s3 }
  0x2c   : > { %p1084_p12 = pnand %p1082_p9, %p1382_p13 }
  0x2e   : > { %p1085_p2 = pneg %p1084_p12 }
  0x30   : > { %p1090_p4 = pnand %p1088_p1, %p1085_p2 }
  0x32   : > { %1093 = shalt.err (!%p1090_p4)
}
  0x33   : > { %s1094_s28 = scalar_lea.vmem %s1370_s30, 1024  ;;  %p1102_p3 = scmp.lt.s32.totalorder %s1370_s30, %s1370_s30 }
  0x34   : > { %p1095_p6 = scmp.ne.s32.totalorder %s1370_s30, %s1094_s28  ;;  %p1103_p5 = scmp.lt.s32.totalorder %s1094_s28, %s1094_s28 }
  0x36   : > { %p1097_p8 = pnand %p1095_p6, %p1382_p13  ;;  %p1104_p7 = por %p1103_p5, %p1102_p3 }
  0x38   : > { %p1098_p0 = pneg %p1097_p8 }
  0x3a   : > { %p1105_p10 = pnand %p1104_p7, %p1098_p0 }
  0x3c   : > { %1108 = shalt.err (!%p1105_p10)
}
  0x3d   : > { %s1274_s15 = smov 128   ;;  %s1275_s16 = smov 8  }
  0x3e   : > { %951 = dma.hbm_to_vmem [thread:$0]  (!%p1366_p11), %s1709_s3, 1024, %s1370_s30, [#allocation9], %s1274_s15, %s1274_s15, %s1275_s16  }
  0x3f   : > { %s1109_s7 = scalar_lea.hbm %s1708_s2, 64 }
  0x40   : > { %p1110_p9 = scmp.ne.s32.totalorder %s1708_s2, %s1109_s7  ;;  %p1116_p1 = scmp.lt.u32.totalorder %s1109_s7, %s1708_s2 }
  0x42   : > { %p1112_p12 = pnand %p1110_p9, %p1382_p13 }
  0x44   : > { %p1113_p2 = pneg %p1112_p12 }
  0x46   : > { %p1118_p4 = pnand %p1116_p1, %p1113_p2 }
  0x48   : > { %1121 = shalt.err (!%p1118_p4)
}
  0x49   : > { %s1122_s13 = scalar_lea.vmem %s189_s8, 64  ;;  %p1130_p3 = scmp.lt.s32.totalorder %s189_s8, %s189_s8 }
  0x4a   : > { %p1123_p6 = scmp.ne.s32.totalorder %s189_s8, %s1122_s13  ;;  %p1131_p5 = scmp.lt.s32.totalorder %s1122_s13, %s1122_s13 }
  0x4c   : > { %p1125_p8 = pnand %p1123_p6, %p1382_p13  ;;  %p1132_p7 = por %p1131_p5, %p1130_p3 }
  0x4e   : > { %p1126_p0 = pneg %p1125_p8 }
  0x50   : > { %p1133_p10 = pnand %p1132_p7, %p1126_p0 }
  0x52   : > { %1136 = shalt.err (!%p1133_p10)
}
  0x53   : > { %948 = dma.hbm_to_vmem [thread:$0]  (!%p1366_p11), %s1708_s2, 64, %s189_s8, [#allocation6]  }
  0x54   : > { %s1276_s17 = smov [#allocation10]   ;;  %s1137_s7 = scalar_lea.hbm %s1710_s4, 1024 }
  0x55   : > { %s211_s23 = sshll.u32 %s1276_s17, 4  ;;  %p1138_p9 = scmp.ne.s32.totalorder %s1710_s4, %s1137_s7  ;;  %s212_s23 = int_to_ptr.vmem [resolvable:$true] %s211_s23 }
  0x56   : > { %p1144_p1 = scmp.lt.u32.totalorder %s1137_s7, %s1710_s4 }
  0x57   : > { %p1140_p12 = pnand %p1138_p9, %p1382_p13 }
  0x59   : > { %p1141_p2 = pneg %p1140_p12 }
  0x5b   : > { %p1146_p4 = pnand %p1144_p1, %p1141_p2 }
  0x5d   : > { %1149 = shalt.err (!%p1146_p4)
}
  0x5e   : > { %s1150_s8 = scalar_lea.vmem %s212_s23, 1024  ;;  %p1158_p3 = scmp.lt.s32.totalorder %s212_s23, %s212_s23 }
  0x5f   : > { %p1151_p6 = scmp.ne.s32.totalorder %s212_s23, %s1150_s8  ;;  %p1159_p5 = scmp.lt.s32.totalorder %s1150_s8, %s1150_s8 }
  0x61   : > { %p1153_p8 = pnand %p1151_p6, %p1382_p13  ;;  %p1160_p7 = por %p1159_p5, %p1158_p3 }
  0x63   : > { %p1154_p0 = pneg %p1153_p8 }
  0x65   : > { %p1161_p10 = pnand %p1160_p7, %p1154_p0 }
  0x67   : > { %1164 = shalt.err (!%p1161_p10)
}
  0x68   : > { %954 = dma.hbm_to_vmem [thread:$0]  (!%p1366_p11), %s1710_s4, 1024, %s212_s23, [#allocation9], %s1274_s15, %s1274_s15, %s1275_s16  }
  0x69   : > { %s1465_s14 = sadd.s32 1, %s1269_s21   ;;  %s30_s6 = sadd.s32 1, %s1265_s20 }
  0x6a   : > { %s27_s28 = ssub.s32 %s1269_s21, %s1465_s14  ;;  %p37_p13 = scmp.ne.s32.totalorder %s1265_s20, %s1261_s19 }
  0x6b   : > { %p28_p9 = scmp.eq.s32.totalorder %s27_s28, 0  ;;  %p38_p12 = scmp.eq.s32.totalorder %s1269_s21, 0 }
  0x6c   : > { %p1720_p2 = scmp.eq.s32.totalorder %s1338_s22, 1  ;;  %p967_p4 = scmp.lt.s32.totalorder %s1269_s21, 2 }
  0x6d   : > { %s1481_s27 = scalar_select %p28_p9, %s1265_s20, %s30_s6  }
  0x6e   : > { %p1475_p1 = por %p1720_p2, %p37_p13  ;;  %p39_p6 = por %p38_p12, %p37_p13 }
  0x6f   : > { %s225_s29 = sand.u32 1, %s1265_s20   ;;  %s857_s15 = sshll.u32 %s1269_s21, 11 }
  0x70   : > { %s824_s7 = sshll.u32 %s225_s29, 7  ;;  %s1488_s9 = scalar_lea.hbm %s1706_s0, %s857_s15 }
  0x71   : > { %s229_s10 = scalar_lea.vmem [#allocation2], %s824_s7  ;;  %p1492_p11 = pnand %p967_p4, %p39_p6 }
  0x72   : > { %s236_s11 = sshll.u32 %s229_s10, 4  ;;  %s1496_s8 = scalar_lea.sflag [#allocation3], %s225_s29  ;;  %s1490_s11 = int_to_ptr.vmem [resolvable:$true] %s236_s11 }
  0x73   : > { %s1165_s13 = scalar_lea.hbm %s1488_s9, 2048  ;;  %p1167_p0 = pneg %p1492_p11 }
  0x74   : > { %p1166_p8 = scmp.ne.s32.totalorder %s1488_s9, %s1165_s13  ;;  %s1170_s28 = scalar_lea.hbm %s1706_s0, 4096 }
  0x75   : > { %p1171_p7 = scmp.lt.u32.totalorder %s1488_s9, %s1706_s0  ;;  %p1172_p10 = scmp.lt.u32.totalorder %s1170_s28, %s1165_s13 }
  0x76   : > { %p1168_p3 = pnand %p1167_p0, %p1166_p8  ;;  %p1174_p9 = scmp.lt.u32.totalorder %s1165_s13, %s1488_s9 }
  0x77   : > { %p1173_p13 = por %p1172_p10, %p1171_p7 }
  0x78   : > { %p1169_p5 = pneg %p1168_p3 }
  0x79   : > { %p1175_p12 = por %p1174_p9, %p1173_p13 }
  0x7b   : > { %p1176_p2 = pnand %p1175_p12, %p1169_p5 }
  0x7d   : > { %1179 = shalt.err (!%p1176_p2)
}
  0x7e   : > { %s1180_s29 = scalar_lea.vmem %s1490_s11, 2048  ;;  %s1277_s16 = smov [#allocation2]  }
  0x7f   : > { %p1181_p4 = scmp.ne.s32.totalorder %s1490_s11, %s1180_s29  ;;  %s1185_s23 = sshll.u32 %s1277_s16, 4  ;;  %s1186_s23 = int_to_ptr.vmem [resolvable:$false] %s1185_s23 }
  0x80   : > { %s1187_s10 = scalar_lea.vmem %s1186_s23, 4096  ;;  %p1188_p3 = scmp.lt.s32.totalorder %s1490_s11, %s1186_s23 }
  0x81   : > { %p1183_p6 = pnand %p1181_p4, %p1167_p0  ;;  %p1189_p7 = scmp.lt.s32.totalorder %s1187_s10, %s1180_s29 }
  0x83   : > { %p1184_p8 = pneg %p1183_p6  ;;  %p1190_p10 = por %p1189_p7, %p1188_p3 }
  0x85   : > { %p1191_p13 = pnand %p1190_p10, %p1184_p8 }
  0x87   : > { %1194 = shalt.err (!%p1191_p13)
}
  0x88   : > { %s1278_s13 = smov 256   ;;  %s1279_s30 = smov 16  }
  0x89   : > { %958 = dma.hbm_to_vmem [thread:$0]  (!%p1492_p11), %s1488_s9, 2048, %s1490_s11, %s1496_s8, %s1278_s13, %s1278_s13, %s1279_s30  }
  0x8a   : > { %p1723_p0 = scmp.ne.s32.totalorder %s1717_s26, 0 }
  0x8b   : > { %s1527_s6 = sand.u32 (!%p1723_p0), 1, %s1261_s19   ;;  %p1724_p5 = scmp.ne.s32.totalorder (!%p1723_p0), %s1715_s24, 0 }
  0x8c   : > { %248 = sbr.rel (%p1723_p0) target bundleno = 951 (0x3b7), region = 40  ;;  %s828_s28 = sshll.u32 (!%p1723_p0), %s1527_s6, 7 }
  0x8d   : > { %s251_s7 = scalar_lea.sflag (!%p1723_p0), [#allocation3], %s1527_s6  ;;  %s1533_s15 = scalar_lea.vmem (!%p1723_p0), [#allocation2], %s828_s28 }
  0x93   : > { %1240 = dma.done.wait (%p1724_p5), %s251_s7, 2048  }
  0x94   : > { %1242 = vsyncadd (%p1724_p5), %s251_s7, 4294965248  ;;  %p1725_p11 = scmp.eq.s32.totalorder %s1338_s22, 0 }
  0x96   : > { %1244 = dma.done.wait (%p1725_p11), [#allocation6], 128   ;;  %p1726_p9 = pmov %p1725_p11 }
  0x98   : > { %1246 = vsyncadd (%p1726_p9), [#allocation6], 4294967168  ;;  %p1727_p12 = pmov %p1726_p9 }
  0x99   : > { %p1728_p2 = pmov %p1726_p9 }
  0x9a   : > { %1248 = dma.done.wait (%p1727_p12), [#allocation9], 2048  }
  0x9b   : > { %1250 = vsyncadd (%p1728_p2), [#allocation9], 4294965248  ;;  %v1548_v0 = vld [vmem:[%s1533_s15 + $0x20] sm:$0xff]  ;;  %v1551_v1 = vld [vmem:[%s1533_s15 + $0x28] sm:$0xff]  ;;  %v1280_v24 = vmov 0.0|0.0   ;;  %vm1281_vm0 = vmmov 0  }
  0x9c   : > { %v1554_v2 = vld [vmem:[%s1533_s15] sm:$0xff]  ;;  %v319_v3 = vadd.f32 %v1551_v1, %v1548_v0  ;;  %v1559_v4 = vld [vmem:[%s1533_s15 + $0x8] sm:$0xff]  ;;  %v1562_v5 = vld [vmem:[%s1533_s15 + $0x30] sm:$0xff]  ;;  %910 = vmatprep.subr.bf16.mxu0 %v1280_v24  ;;  %v1282_v25 = vmov 0.0   ;;  %vm347_vm1 = vcmask 523264   ;;  %vm438_vm2 = vcmask 31744  }
  0x9d   : > { %v1565_v6 = vld [vmem:[%s1533_s15 + $0x38] sm:$0xff]  ;;  %v313_v7 = vadd.f32 %v1559_v4, %v1554_v2  ;;  %v1570_v8 = vld [vmem:[%s1533_s15 + $0x10] sm:$0xff]  ;;  %v1586_v14 = vld [vmem:[%s1533_s15 + $0x40] sm:$0xff]  ;;  %893 = vmatprep.mubr.msk.f32.mxu0 %vm1281_vm0, %v1282_v25  ;;  %vm463_vm3 = vcmask 1043456   ;;  %v1283_v60 = vmov 0   ;;  %s1625_s24 = scalar_lea.vmem [#allocation11], %s828_s28 }
  0x9e   : > { %v1573_v9 = vld [vmem:[%s1533_s15 + $0x18] sm:$0xff]  ;;  %320 = vadd.xlane.f32.xlu1 %v319_v3  ;;  %v322_v10 = vadd.f32 %v1565_v6, %v1562_v5  ;;  %v1580_v12 = vld [vmem:[%s1533_s15 + $0x50] sm:$0xff]  ;;  %v1589_v15 = vld [vmem:[%s1533_s15 + $0x48] sm:$0xff]  ;;  %1019 = vset.pattern.permute.xlu0 %v1283_v60  ;;  %s858_s26 = sshll.u32 %s1338_s22, 11  ;;  %s706_s9 = sshll.u32 %s1625_s24, 4  ;;  %s1658_s9 = int_to_ptr.vmem [resolvable:$true] %s706_s9 }
  0x9f   : > { %314 = vadd.xlane.f32.xlu0 %v313_v7  ;;  %v316_v11 = vadd.f32 %v1573_v9, %v1570_v8  ;;  %v1583_v13 = vld [vmem:[%s1533_s15 + $0x58] sm:$0xff]  ;;  %v325_v17 = vadd.f32 %v1589_v15, %v1586_v14  ;;  %v1596_v18 = vld [vmem:[%s1533_s15 + $0x70] sm:$0xff]  ;;  %v1602_v20 = vld [vmem:[%s1533_s15 + $0x60] sm:$0xff]  ;;  %1020 = vset.pattern.permute.xlu1 %v1283_v60  ;;  %s1656_s8 = scalar_lea.hbm %s1711_s5, %s858_s26  ;;  %s693_s22 = scalar_lea.sflag [#allocation4], %s1527_s6 }
  0xa0   : > { %v328_v16 = vadd.f32 %v1583_v13, %v1580_v12  ;;  %v1599_v19 = vld [vmem:[%s1533_s15 + $0x78] sm:$0xff]  ;;  %v1605_v21 = vld [vmem:[%s1533_s15 + $0x68] sm:$0xff]  ;;  %v345_v46 = vld [vmem:[#allocation5] sm:$0xf]  ;;  %s1195_s29 = scalar_lea.vmem %s1658_s9, 2048  ;;  %s1284_s16 = smov [#allocation11]  }
  0xa1   : > { %v334_v22 = vadd.f32 %v1599_v19, %v1596_v18  ;;  %v331_v23 = vadd.f32 %v1605_v21, %v1602_v20  ;;  %v422_v47 = vld [vmem:[#allocation8] sm:$0xff]  ;;  %v346_v48 = vld [vmem:[#allocation7] sm:$0xf]  ;;  %v423_v53 = vld [vmem:[#allocation8 + $0x8] sm:$0xff]  ;;  %p1196_p4 = scmp.ne.s32.totalorder %s1658_s9, %s1195_s29  ;;  %s1199_s23 = sshll.u32 %s1284_s16, 4  ;;  %s1200_s23 = int_to_ptr.vmem [resolvable:$false] %s1199_s23 }
  0xa2   : > { %323 = vadd.xlane.f32.xlu1 %v322_v10  ;;  %898 = vmatprep.mubr.msk.f32.mxu1 %vm438_vm2, %v422_v47  ;;  %v424_v54 = vld [vmem:[#allocation8 + $0x10] sm:$0xff]  ;;  %v425_v55 = vld [vmem:[#allocation8 + $0x18] sm:$0xff]  ;;  %v426_v56 = vld [vmem:[#allocation8 + $0x20] sm:$0xff]  ;;  %s1201_s10 = scalar_lea.vmem %s1200_s23, 4096  ;;  %p1202_p3 = scmp.lt.s32.totalorder %s1658_s9, %s1200_s23 }
  0xa3   : > { %317 = vadd.xlane.f32.xlu0 %v316_v11  ;;  %v427_v57 = vld [vmem:[#allocation8 + $0x28] sm:$0xff]  ;;  %v428_v58 = vld [vmem:[#allocation8 + $0x30] sm:$0xff]  ;;  %v429_v59 = vld [vmem:[#allocation8 + $0x38] sm:$0xff]  ;;  %p1197_p6 = pnand %p1196_p4, %p1475_p1  ;;  %p1203_p7 = scmp.lt.s32.totalorder %s1201_s10, %s1195_s29 }
  0xa4   : > { %v431_v61 = vld [vmem:[#allocation10 + $0x8] sm:$0xff]  ;;  %v430_v62 = vld [vmem:[#allocation10] sm:$0xff]  ;;  %v433_v11 = vld [vmem:[#allocation10 + $0x18] sm:$0xff] }
  0xa5   : > { %p1198_p8 = pneg %p1197_p6  ;;  %p1204_p10 = por %p1203_p7, %p1202_p3 }
  0xa6   : > { %329 = vadd.xlane.f32.xlu1 %v328_v16 }
  0xa7   : > { %326 = vadd.xlane.f32.xlu0 %v325_v17  ;;  %v432_v17 = vld [vmem:[#allocation10 + $0x10] sm:$0xff]  ;;  %p1205_p13 = pnand %p1204_p10, %p1198_p8 }
  0xaa   : > { %335 = vadd.xlane.f32.xlu1 %v334_v22 }
  0xab   : > { %332 = vadd.xlane.f32.xlu0 %v331_v23 }
 0x12b   : > { %v321_v26 = vpop.xlane.xlu1 %320 }
 0x12c   : > { %v315_v27 = vpop.xlane.xlu0 %314  ;;  %v339_v32 = vmul.f32 0.00390625, %v321_v26 }
 0x12d   : > { %v337_v30 = vmul.f32 0.00390625, %v315_v27  ;;  %v435_v27 = vld [vmem:[#allocation10 + $0x28] sm:$0xff] }
 0x12f   : > { %v324_v28 = vpop.xlane.xlu1 %323 }
 0x130   : > { %v318_v29 = vpop.xlane.xlu0 %317  ;;  %v340_v33 = vmul.f32 0.00390625, %v324_v28 }
 0x131   : > { %v338_v31 = vmul.f32 0.00390625, %v318_v29  ;;  %v434_v29 = vld [vmem:[#allocation10 + $0x20] sm:$0xff] }
 0x132   : > { %v914_v39 = vpack.c.bf16 %v340_v33, %v339_v32 }
 0x133   : > { %v911_v34 = vpack.c.bf16 %v338_v31, %v337_v30  ;;  %v330_v35 = vpop.xlane.xlu1 %329 }
 0x134   : > { %v327_v36 = vpop.xlane.xlu0 %326  ;;  %v342_v37 = vmul.f32 0.00390625, %v330_v35 }
 0x135   : > { %912 = vmatpush3.bf16.msra.mxu0 %v911_v34  ;;  %v341_v38 = vmul.f32 0.00390625, %v327_v36  ;;  %v436_v36 = vld [vmem:[#allocation10 + $0x30] sm:$0xff] }
 0x136   : > { %913 = vmatprep.subr.bf16.mxu0 %v1280_v24 }
 0x137   : > { %v336_v40 = vpop.xlane.xlu1 %335  ;;  %v917_v42 = vpack.c.bf16 %v342_v37, %v341_v38 }
 0x138   : > { %v333_v41 = vpop.xlane.xlu0 %332  ;;  %v344_v43 = vmul.f32 0.00390625, %v336_v40  ;;  %v437_v40 = vld [vmem:[#allocation10 + $0x38] sm:$0xff] }
 0x139   : > { %915 = vmatpush3.bf16.msra.mxu0 %v914_v39  ;;  %v343_v44 = vmul.f32 0.00390625, %v333_v41 }
 0x13a   : > { %916 = vmatprep.subr.bf16.mxu0 %v1280_v24 }
 0x13b   : > { %v920_v45 = vpack.c.bf16 %v344_v43, %v343_v44 }
 0x13d   : > { %918 = vmatpush3.bf16.msra.mxu0 %v917_v42 }
 0x13e   : > { %919 = vmatprep.subr.bf16.mxu0 %v1280_v24 }
 0x141   : > { %921 = vmatpush3.bf16.msra.mxu0 %v920_v45 }
 0x144   : > { %894 = vmatmul.mubr.msk.f32.vlgmr.msra.gmra.mrb[0].mxu0 %vm347_vm1, %v345_v46 }
 0x217   : > { %v417_v49 = vpop.f32.mrb[0].mxu0 }
 0x218   : > { %v418_v50 = vadd.f32 %v417_v49, %v346_v48  ;;  %v895_v51 = vpop.f32.mrb[1].mxu0 }
 0x21a   : > { %v421_v52 = vmax.f32 %v418_v50, 0.0 }
 0x21c   : > { %896 = vmatprep.subr.msk.mxu1 %vm463_vm3, %v421_v52 }
 0x21d   : > { %897 = vmatpush3.msk.msra.mxu1 %vm463_vm3, %v421_v52 }
 0x21e   : > { %899 = vmatmul.mubr.msk.f32.vlgmr.msra.gmra.mrb[0].mxu1 %vm438_vm2, %v423_v53 }
 0x21f   : > { %901 = vmatprep.mubr.msk.f32.mxu1 %vm438_vm2, %v424_v54 }
 0x222   : > { %902 = vmatmul.mubr.msk.f32.gmra.mrb[2].mxu1 %vm438_vm2, %v425_v55 }
 0x223   : > { %904 = vmatprep.mubr.msk.f32.mxu1 %vm438_vm2, %v426_v56 }
 0x226   : > { %905 = vmatmul.mubr.msk.f32.gmra.mrb[4].mxu1 %vm438_vm2, %v427_v57 }
 0x227   : > { %907 = vmatprep.mubr.msk.f32.mxu1 %vm438_vm2, %v428_v58 }
 0x22a   : > { %908 = vmatmul.mubr.msk.f32.gmra.mrb[6].mxu1 %vm438_vm2, %v429_v59 }
 0x2f1   : > { %v900_v63 = vpop.f32.mrb[0].mxu1 }
 0x2f2   : > { %v539_v3 = vadd.f32 %v900_v63, %v431_v61  ;;  %v533_v7 = vpop.f32.mrb[1].mxu1 }
 0x2f3   : > { %v534_v10 = vadd.f32 %v533_v7, %v430_v62 }
 0x2f4   : > { %v845_v16 = vmul.f32 -1.442695, %v539_v3 }
 0x2f5   : > { %v844_v22 = vmul.f32 -1.442695, %v534_v10  ;;  %v903_v23 = vpop.f32.mrb[2].mxu1 }
 0x2f6   : > { %1021 = vpow2.f32 %v845_v16  ;;  %v549_v24 = vadd.f32 %v903_v23, %v433_v11  ;;  %v543_v25 = vpop.f32.mrb[3].mxu1 }
 0x2f7   : > { %1023 = vpow2.f32 %v844_v22  ;;  %v544_v26 = vadd.f32 %v543_v25, %v432_v17 }
 0x2f8   : > { %v847_v28 = vmul.f32 -1.442695, %v549_v24 }
 0x2f9   : > { %v846_v30 = vmul.f32 -1.442695, %v544_v26  ;;  %v906_v31 = vpop.f32.mrb[4].mxu1 }
 0x2fa   : > { %1025 = vpow2.f32 %v847_v28  ;;  %v559_v32 = vadd.f32 %v906_v31, %v435_v27  ;;  %v553_v33 = vpop.f32.mrb[5].mxu1 }
 0x2fb   : > { %1027 = vpow2.f32 %v846_v30  ;;  %v554_v34 = vadd.f32 %v553_v33, %v434_v29 }
 0x2fc   : > { %v849_v35 = vmul.f32 -1.442695, %v559_v32 }
 0x2fd   : > { %v909_v37 = vpop.f32.mrb[6].mxu1  ;;  %v848_v38 = vmul.f32 -1.442695, %v554_v34 }
 0x2fe   : > { %1029 = vpow2.f32 %v849_v35  ;;  %v563_v39 = vpop.f32.mrb[7].mxu1  ;;  %v569_v47 = vadd.f32 %v909_v37, %v437_v40 }
 0x2ff   : > { %v564_v41 = vadd.f32 %v563_v39, %v436_v36  ;;  %1031 = vpow2.f32 %v848_v38 }
 0x300   : > { %v1022_v42 = vpop.eup %1021  ;;  %v851_v51 = vmul.f32 -1.442695, %v569_v47 }
 0x301   : > { %v1024_v43 = vpop.eup %1023  ;;  %v597_v44 = vadd.f32 1.0, %v1022_v42  ;;  %v850_v45 = vmul.f32 -1.442695, %v564_v41 }
 0x302   : > { %v596_v46 = vadd.f32 1.0, %v1024_v43 }
 0x303   : > { %1033 = vrcp.f32 %v597_v44 }
 0x304   : > { %v1026_v48 = vpop.eup %1025  ;;  %1035 = vrcp.f32 %v596_v46 }
 0x305   : > { %v1028_v49 = vpop.eup %1027  ;;  %v599_v50 = vadd.f32 1.0, %v1026_v48  ;;  %1037 = vpow2.f32 %v850_v45 }
 0x306   : > { %v598_v52 = vadd.f32 1.0, %v1028_v49 }
 0x307   : > { %1039 = vrcp.f32 %v599_v50 }
 0x308   : > { %v1030_v53 = vpop.eup %1029  ;;  %1041 = vpow2.f32 %v851_v51 }
 0x309   : > { %v601_v54 = vadd.f32 1.0, %v1030_v53  ;;  %1043 = vrcp.f32 %v598_v52  ;;  %v1032_v55 = vpop.eup %1031 }
 0x30a   : > { %v600_v59 = vadd.f32 1.0, %v1032_v55 }
 0x30b   : > { %1045 = vrcp.f32 %v601_v54 }
 0x30c   : > { %1047 = vrcp.f32 %v600_v59 }
 0x30d   : > { %v1034_v56 = vpop.eup %1033 }
 0x30e   : > { %v1036_v57 = vpop.eup %1035  ;;  %627 = vperm.xlu1 %1020, %v1034_v56  }
 0x30f   : > { %v1038_v58 = vpop.eup %1037  ;;  %622 = vperm.xlu0 %1019, %v1036_v57  }
 0x310   : > { %v602_v61 = vadd.f32 1.0, %v1038_v58 }
 0x311   : > { %v1040_v60 = vpop.eup %1039 }
 0x312   : > { %637 = vperm.xlu1 %1020, %v1040_v60   ;;  %v1042_v62 = vpop.eup %1041  ;;  %1049 = vrcp.f32 %v602_v61 }
 0x313   : > { %v1044_v63 = vpop.eup %1043  ;;  %v603_v7 = vadd.f32 1.0, %v1042_v62 }
 0x315   : > { %v1046_v3 = vpop.eup %1045  ;;  %1051 = vrcp.f32 %v603_v7 }
 0x316   : > { %632 = vperm.xlu1 %1020, %v1044_v63   ;;  %v1048_v10 = vpop.eup %1047 }
 0x31a   : > { %647 = vperm.xlu1 %1020, %v1046_v3  }
 0x31c   : > { %v1050_v11 = vpop.eup %1049 }
 0x31e   : > { %642 = vperm.xlu1 %1020, %v1048_v10  }
 0x31f   : > { %v1052_v16 = vpop.eup %1051 }
 0x322   : > { %652 = vperm.xlu1 %1020, %v1050_v11  }
 0x326   : > { %657 = vperm.xlu1 %1020, %v1052_v16  }
 0x38d   : > { %v628_v17 = vpop.permute.xlu1 %627 }
 0x38e   : > { %v662_v22 = vmul.f32 %v628_v17, %v1570_v8  ;;  %v663_v23 = vmul.f32 %v628_v17, %v1573_v9  ;;  %v623_v24 = vpop.permute.xlu0 %622 }
 0x38f   : > { %v660_v25 = vmul.f32 %v623_v24, %v1554_v2  ;;  %v661_v26 = vmul.f32 %v623_v24, %v1559_v4 }
 0x390   : > { %678 = vst [vmem:[%s1625_s24 + $0x10] sm:$0xff] %v662_v22  ;;  %679 = vst [vmem:[%s1625_s24 + $0x18] sm:$0xff] %v663_v23 }
 0x391   : > { %676 = vst [vmem:[%s1625_s24] sm:$0xff] %v660_v25  ;;  %677 = vst [vmem:[%s1625_s24 + $0x8] sm:$0xff] %v661_v26  ;;  %v638_v2 = vpop.permute.xlu1 %637 }
 0x392   : > { %v666_v4 = vmul.f32 %v638_v2, %v1562_v5  ;;  %v667_v8 = vmul.f32 %v638_v2, %v1565_v6 }
 0x394   : > { %682 = vst [vmem:[%s1625_s24 + $0x30] sm:$0xff] %v666_v4  ;;  %683 = vst [vmem:[%s1625_s24 + $0x38] sm:$0xff] %v667_v8 }
 0x395   : > { %v633_v9 = vpop.permute.xlu1 %632 }
 0x396   : > { %v664_v27 = vmul.f32 %v633_v9, %v1548_v0  ;;  %v665_v28 = vmul.f32 %v633_v9, %v1551_v1 }
 0x398   : > { %680 = vst [vmem:[%s1625_s24 + $0x20] sm:$0xff] %v664_v27  ;;  %681 = vst [vmem:[%s1625_s24 + $0x28] sm:$0xff] %v665_v28 }
 0x399   : > { %v648_v29 = vpop.permute.xlu1 %647 }
 0x39a   : > { %v670_v5 = vmul.f32 %v648_v29, %v1580_v12  ;;  %v671_v6 = vmul.f32 %v648_v29, %v1583_v13 }
 0x39c   : > { %686 = vst [vmem:[%s1625_s24 + $0x50] sm:$0xff] %v670_v5  ;;  %687 = vst [vmem:[%s1625_s24 + $0x58] sm:$0xff] %v671_v6 }
 0x39d   : > { %v643_v30 = vpop.permute.xlu1 %642 }
 0x39e   : > { %v668_v31 = vmul.f32 %v643_v30, %v1586_v14  ;;  %v669_v0 = vmul.f32 %v643_v30, %v1589_v15 }
 0x3a0   : > { %684 = vst [vmem:[%s1625_s24 + $0x40] sm:$0xff] %v668_v31  ;;  %685 = vst [vmem:[%s1625_s24 + $0x48] sm:$0xff] %v669_v0 }
 0x3a1   : > { %v653_v1 = vpop.permute.xlu1 %652 }
 0x3a2   : > { %v672_v32 = vmul.f32 %v653_v1, %v1602_v20  ;;  %v673_v12 = vmul.f32 %v653_v1, %v1605_v21 }
 0x3a4   : > { %688 = vst [vmem:[%s1625_s24 + $0x60] sm:$0xff] %v672_v32  ;;  %689 = vst [vmem:[%s1625_s24 + $0x68] sm:$0xff] %v673_v12 }
 0x3a5   : > { %v658_v13 = vpop.permute.xlu1 %657 }
 0x3a6   : > { %v674_v14 = vmul.f32 %v658_v13, %v1596_v18  ;;  %v675_v15 = vmul.f32 %v658_v13, %v1599_v19 }
 0x3a8   : > { %690 = vst [vmem:[%s1625_s24 + $0x70] sm:$0xff] %v674_v14  ;;  %691 = vst [vmem:[%s1625_s24 + $0x78] sm:$0xff] %v675_v15 }
 0x3a9   : > { %1208 = shalt.err (!%p1205_p13)
}
 0x3aa   : > { %s1209_s13 = scalar_lea.hbm %s1656_s8, 2048  ;;  %s1213_s7 = scalar_lea.hbm %s1711_s5, 4096 }
 0x3ab   : > { %p1210_p0 = scmp.ne.s32.totalorder %s1656_s8, %s1209_s13  ;;  %p1214_p9 = scmp.lt.u32.totalorder %s1656_s8, %s1711_s5 }
 0x3ac   : > { %p1215_p12 = scmp.lt.u32.totalorder %s1213_s7, %s1209_s13  ;;  %p1217_p4 = scmp.lt.u32.totalorder %s1209_s13, %s1656_s8 }
 0x3ad   : > { %p1211_p5 = pnand %p1210_p0, %p1475_p1 }
 0x3ae   : > { %p1216_p2 = por %p1215_p12, %p1214_p9 }
 0x3af   : > { %p1212_p11 = pneg %p1211_p5 }
 0x3b0   : > { %p1218_p6 = por %p1217_p4, %p1216_p2 }
 0x3b2   : > { %p1219_p8 = pnand %p1218_p6, %p1212_p11 }
 0x3b4   : > { %1222 = shalt.err (!%p1219_p8)
}
 0x3b5   : > { %s1285_s26 = smov 256   ;;  %s1286_s11 = smov 16  }
 0x3b6   : > { %940 = dma.vmem_to_hbm [thread:$0]  (%p1475_p1), %s1658_s9, 2048, %s1656_s8, %s693_s22, %s1285_s26, %s1285_s26, %s1286_s11  }
 0x3b7 PF: > { %s721_s12 = sand.u32 1, %s1257_s18   ;;  %p1729_p3 = scmp.ne.s32.totalorder %s1716_s25, 0 }
 0x3b8   : > { %p1730_p7 = scmp.ge.s32.totalorder %s1269_s21, 2  ;;  %s722_s29 = scalar_lea.sflag [#allocation4], %s721_s12 }
 0x3ba   : > { %p960_p10 = pnand %p1730_p7, %p1729_p3 }
 0x3bc   : > { %1252 = dma.done.wait (!%p960_p10), %s722_s29, 2048  }
 0x3bd   : > { %1254 = vsyncadd (!%p960_p10), %s722_s29, 4294965248  ;;  %p20_p13 = scmp.ge.s32.totalorder %s1465_s14, 4   ;;  %s1731_s18 = smov %s1261_s19 }
 0x3be   : > { %s1732_s19 = smov %s1265_s20  ;;  %s1733_s20 = smov %s1481_s27 }
 0x3bf   : > { %s1734_s21 = smov %s1465_s14  ;;  %22 = sbr.rel (!%p20_p13) target bundleno = 7 (0x7), region = 101 }
 0x3c6   :  { %727 = vsyncpa [#allocation3], 1 }
 0x3c7   :  { %729 = vsyncpa [#allocation3 + $0x1], 1 }
 0x3c8   :  { %730 = vsyncpa [#allocation6], 1 }
 0x3c9   :  { %731 = vsyncpa [#allocation9], 1 }
 0x3ca   :  { %732 = vsyncpa [#allocation4], 1 }
 0x3cb   :  { %734 = vsyncpa [#allocation4 + $0x1], 1 }

</bundles_post_ra>
